<compile_context>
chip_gen: v6e
topology: v6e:2x2x1
jax: 0.10.0
libtpu: 0.0.40
codegen_flags: <defaults>
</compile_context>

<pallas_src>
import functools

import jax
import jax.numpy as jnp
from jax.experimental import pallas as pl
from jax.experimental.pallas import tpu as pltpu


def _round_up(x, m):
    return ((x + m - 1) // m) * m


def _pad_to(x, rows, cols):
    r, c = x.shape
    if r == rows and c == cols:
        return x
    return jnp.pad(x, ((0, rows - r), (0, cols - c)))


# ----------------------------------------------------------------------------
# Fused kernel: (Linear -> ReLU -> LayerNorm) on a template tile, then the
# Hopfield similarity  beta * Xi @ X_tile^T  against the VMEM-resident Xi.
# Grid = (T tiles [parallel], F reduction tiles [arbitrary]).
# ----------------------------------------------------------------------------
def fused_mhn_kernel(t_ref, w_ref, p_ref, xi_ref, o_ref, acc_ref, *, eps, compute_dtype):
    # t_ref  : [tT, tF]   template fingerprint tile (input dtype; cast in VMEM)
    # w_ref  : [tF, D]    encoder weight tile (compute_dtype)
    # p_ref  : [8, D] f32 packed params: row0 = Linear bias, row1 = beta*LN_gamma,
    #                     row2 = beta*LN_beta (beta pre-folded on host)
    # xi_ref : [N, D]     concatenated Xi_atom|Xi_bond (compute_dtype, VMEM-resident)
    # o_ref  : [N, tT]    beta * Xi @ X_tile^T (lane-dense last dim)
    # acc_ref: [tT, D]    f32 accumulator over the F (k) reduction axis
    k = pl.program_id(1)

    @pl.when(k == 0)
    def _():
        acc_ref[...] = jnp.zeros_like(acc_ref)

    # Encoder matmul partial sum on the MXU (f32 accumulation).  The template tile is cast
    # to the compute dtype here in VMEM rather than in a wrapper-side pre-pass over HBM.
    acc_ref[...] += jnp.dot(t_ref[...].astype(compute_dtype), w_ref[...],
                            preferred_element_type=jnp.float32)

    @pl.when(k == pl.num_programs(1) - 1)
    def _():
        bias = p_ref[0:1, :]       # Linear bias
        gamma_s = p_ref[1:2, :]    # beta * LN weight (folded on host)
        beta_s = p_ref[2:3, :]     # beta * LN bias   (folded on host)
        # Linear bias + ReLU + LayerNorm (biased variance, eps inside rsqrt == torch), f32.
        h = jnp.maximum(acc_ref[...] + bias, 0.0)
        mean = jnp.mean(h, axis=-1, keepdims=True)
        var = jnp.mean(jnp.square(h - mean), axis=-1, keepdims=True)
        # NOTE: zero-padded template rows are constant per row -> var == 0; eps keeps rsqrt
        # finite, the resulting rows equal beta*LN_beta and are sliced off by the wrapper.
        h_norm = (h - mean) * jax.lax.rsqrt(var + eps)
        x_tile = (h_norm * gamma_s + beta_s).astype(compute_dtype)
        # Similarity: Xi @ X_tile^T with both operands contracting on their last dim
        # (native MXU QK^T pattern, no explicit transpose materialized).
        s = jax.lax.dot_general(
            xi_ref[...], x_tile,
            dimension_numbers=(((1,), (1,)), ((), ())),
            preferred_element_type=jnp.float32,
        )
        o_ref[...] = s.astype(o_ref.dtype)


# ----------------------------------------------------------------------------
# LocalMHN forward (linear_fps branch)
# ----------------------------------------------------------------------------
def local_mhn_forward(params, templates, xi_atom, xi_bond, beta, *,
                      tile_t=256, tile_f=2048,
                      w_resident_bytes=16 * 1024 * 1024,
                      compute_dtype=jnp.bfloat16, out_dtype=jnp.float32,
                      eps=1e-5, vmem_limit_bytes=48 * 1024 * 1024):
    T, F = templates.shape
    D = params["w"].shape[1]
    n_atoms = xi_atom.shape[0]
    n_bonds = xi_bond.shape[0]
    n = n_atoms + n_bonds

    itemsize = jnp.dtype(compute_dtype).itemsize
    out_itemsize = jnp.dtype(out_dtype).itemsize

    # --- tile / pad sizes ----------------------------------------------------
    # tile_t >= 128 keeps the output lane-dense; 256 fills the 256-wide MXU on v6e/v7x and
    # halves the number of weight re-stream passes vs 128.
    tile_t = min(tile_t, _round_up(T, 128))
    t_pad = _round_up(T, tile_t)

    f_pad128 = _round_up(F, 128)
    if f_pad128 * D * itemsize <= w_resident_bytes:
        # Whole weight fits a modest VMEM budget: single k step -> W's block index never
        # changes -> it is DMA'd from HBM exactly once and can be single-buffered.
        tile_f = f_pad128
    else:
        tile_f = min(tile_f, f_pad128)
    f_pad = _round_up(F, tile_f)

    # bf16 packs 16 rows per sublane tile; pad N so the Xi block / MXU M dim is unmasked.
    n_pad = _round_up(n, 16)

    num_t = t_pad // tile_t
    num_k = f_pad // tile_f

    # --- wrapper-side operand prep --------------------------------------------
    # templates: pad only (no dtype cast -> no extra full-HBM pre-pass); cast happens
    # per-tile inside the kernel.  W / Xi are (re-)read as bf16 by the kernel, so pre-cast.
    templates_p = _pad_to(templates, t_pad, f_pad)
    w_p = _pad_to(params["w"], f_pad, D).astype(compute_dtype)
    xi_p = _pad_to(jnp.concatenate([xi_atom, xi_bond], axis=0), n_pad, D).astype(compute_dtype)
    # Packed LN/bias params with the Hopfield beta pre-folded (beta may be traced or static).
    packed = jnp.concatenate([
        params["b"].reshape(1, D).astype(jnp.float32),
        (beta * params["gamma"].reshape(1, D)).astype(jnp.float32),
        (beta * params["beta_ln"].reshape(1, D)).astype(jnp.float32),
        jnp.zeros((5, D), jnp.float32),
    ], axis=0)

    # Grid-invariant inputs: single-buffer so Pallas doesn't allocate a wasted second copy.
    if num_k == 1:
        w_spec = pl.BlockSpec((tile_f, D), lambda t, k: (k, 0), pipeline_mode=pl.Buffered(1))
    else:
        w_spec = pl.BlockSpec((tile_f, D), lambda t, k: (k, 0))
    p_spec = pl.BlockSpec((8, D), lambda t, k: (0, 0), pipeline_mode=pl.Buffered(1))
    xi_spec = pl.BlockSpec((n_pad, D), lambda t, k: (0, 0), pipeline_mode=pl.Buffered(1))

    # Advisory cost estimate (lets XLA schedule the surrounding pads/concat/slices sensibly).
    w_hbm_reads = 1 if num_k == 1 else num_t
    cost = pl.CostEstimate(
        flops=int(2 * t_pad * f_pad * D + 2 * n_pad * D * t_pad),
        transcendentals=int(t_pad),
        bytes_accessed=int(
            t_pad * f_pad * jnp.dtype(templates.dtype).itemsize
            + w_hbm_reads * f_pad * D * itemsize
            + n_pad * D * itemsize
            + 8 * D * 4
            + n_pad * t_pad * out_itemsize),
    )

    out = pl.pallas_call(
        functools.partial(fused_mhn_kernel, eps=eps, compute_dtype=compute_dtype),
        out_shape=jax.ShapeDtypeStruct((n_pad, t_pad), out_dtype),
        grid_spec=pltpu.PrefetchScalarGridSpec(
            num_scalar_prefetch=0,
            grid=(num_t, num_k),
            in_specs=[
                pl.BlockSpec((tile_t, tile_f), lambda t, k: (t, k)),   # template tile
                w_spec,                                                # weight tile
                p_spec,                                                # packed bias/LN params
                xi_spec,                                               # Xi (VMEM-resident)
            ],
            out_specs=pl.BlockSpec((n_pad, tile_t), lambda t, k: (0, t)),
            scratch_shapes=[pltpu.VMEM((tile_t, D), jnp.float32)],
        ),
        compiler_params=pltpu.CompilerParams(
            # t axis "parallel" -> shards across v7x's 2 TensorCores when num_t >= 2.
            dimension_semantics=("parallel", "arbitrary"),
            vmem_limit_bytes=vmem_limit_bytes,
        ),
        cost_estimate=cost,
    )(templates_p, w_p, packed, xi_p)

    xxi_atom = out[:n_atoms, :T]
    xxi_bond = out[n_atoms:n, :T]
    return xxi_atom, xxi_bond


def _reference(params, templates, xi_atom, xi_bond, beta, eps=1e-5):
    h = jnp.maximum(templates @ params["w"] + params["b"], 0.0)
    mu = h.mean(-1, keepdims=True)
    var = ((h - mu) ** 2).mean(-1, keepdims=True)
    x = (h - mu) / jnp.sqrt(var + eps) * params["gamma"] + params["beta_ln"]
    return beta * (xi_atom @ x.T), beta * (xi_bond @ x.T)


if __name__ == "__main__":
    # Small, TPU-friendly demo shapes (real MHN: fp_size 4k-30k, T in the tens of thousands;
    # the tiled grid above scales to those shapes without code changes).
    fp_size = 128      # args.fp_size
    out_size = 128     # args.out_size
    n_templates = 16   # number of reaction templates
    n_atoms = 16       # nodes in the batched molecule graph
    n_bonds = 32       # edges in the batched molecule graph
    hopfield_beta = 0.125  # args.beta

    key = jax.random.PRNGKey(0)
    k_t, k_w, k_b, k_xa, k_xb, k_t2, k_w2, k_g2, k_bl2 = jax.random.split(key, 9)

    templates = jax.random.normal(k_t, (n_templates, fp_size), dtype=jnp.float32)
    params = {
        "w": jax.random.normal(k_w, (fp_size, out_size), dtype=jnp.float32)
        * (1.0 / jnp.sqrt(fp_size)),
        "b": jax.random.normal(k_b, (1, out_size), dtype=jnp.float32) * 0.01,
        "gamma": jnp.ones((1, out_size), dtype=jnp.float32),     # LayerNorm weight
        "beta_ln": jnp.zeros((1, out_size), dtype=jnp.float32),  # LayerNorm bias
    }

    # Stand-ins for molecule_encoder (LocalRetro) outputs.
    xi_atom = jax.random.normal(k_xa, (n_atoms, out_size), dtype=jnp.float32)
    xi_bond = jax.random.normal(k_xb, (n_bonds, out_size), dtype=jnp.float32)

    ref_atom, ref_bond = _reference(params, templates, xi_atom, xi_bond, hopfield_beta)

    # 1) f32 compute path (resident-W single-k path): must match the reference tightly.
    a32, b32 = local_mhn_forward(params, templates, xi_atom, xi_bond, hopfield_beta,
                                 compute_dtype=jnp.float32)
    jax.block_until_ready((a32, b32))
    assert a32.shape == (n_atoms, n_templates) and b32.shape == (n_bonds, n_templates)
    assert jnp.allclose(a32, ref_atom, atol=1e-4, rtol=1e-4)
    assert jnp.allclose(b32, ref_bond, atol=1e-4, rtol=1e-4)

    # 2) bf16 operands / f32 accumulation (the performance configuration; looser tolerance).
    a16, b16 = local_mhn_forward(params, templates, xi_atom, xi_bond, hopfield_beta,
                                 compute_dtype=jnp.bfloat16)
    jax.block_until_ready((a16, b16))
    assert a16.shape == (n_atoms, n_templates) and b16.shape == (n_bonds, n_templates)
    assert jnp.allclose(a16, ref_atom, atol=1e-1, rtol=1e-1)
    assert jnp.allclose(b16, ref_bond, atol=1e-1, rtol=1e-1)

    # 3) Exercise the fully tiled path (multiple t tiles, multiple k reduction steps) by
    #    forcing F tiling with a tiny resident-W budget; f32 compute for a tight check.
    T2, F2 = 300, 300
    templates2 = jax.random.normal(k_t2, (T2, F2), dtype=jnp.float32)
    params2 = {
        "w": jax.random.normal(k_w2, (F2, out_size), dtype=jnp.float32) * (1.0 / jnp.sqrt(F2)),
        "b": params["b"],
        "gamma": 1.0 + 0.1 * jax.random.normal(k_g2, (1, out_size), dtype=jnp.float32),
        "beta_ln": 0.05 * jax.random.normal(k_bl2, (1, out_size), dtype=jnp.float32),
    }
    ref_atom2, ref_bond2 = _reference(params2, templates2, xi_atom, xi_bond, hopfield_beta)
    a2, b2 = local_mhn_forward(params2, templates2, xi_atom, xi_bond, hopfield_beta,
                               tile_t=256, tile_f=128, w_resident_bytes=0,
                               compute_dtype=jnp.float32)
    jax.block_until_ready((a2, b2))
    assert a2.shape == (n_atoms, T2) and b2.shape == (n_bonds, T2)
    assert jnp.allclose(a2, ref_atom2, atol=1e-3, rtol=1e-3)
    assert jnp.allclose(b2, ref_bond2, atol=1e-3, rtol=1e-3)

    print("KERNEL_OK")
</pallas_src>

<mosaic_0001>
module attributes {stable_mosaic.version = 11 : i64} {
  func.func @fused_mhn_kernel(%arg0: i32, %arg1: i32, %arg2: memref<128x128xf32, #tpu.memory_space<vmem>>, %arg3: memref<128x128xf32, #tpu.memory_space<vmem>>, %arg4: memref<8x128xf32, #tpu.memory_space<vmem>>, %arg5: memref<48x128xf32, #tpu.memory_space<vmem>>, %arg6: memref<48x128xf32, #tpu.memory_space<vmem>>, %arg7: memref<128x128xf32, #tpu.memory_space<vmem>>) attributes {dimension_semantics = [#tpu.dimension_semantics<parallel>, #tpu.dimension_semantics<arbitrary>], iteration_bounds = array<i64: 1, 1>, scalar_prefetch = 0 : i64, scratch_operands = 1 : i64, tpu.core_type = #tpu.core_type<tc>, window_params = [{transform_indices = @transform_0, window_bounds = array<i64: 128, 128>}, {pipeline_mode = #tpu.pipeline_mode<synchronous>, transform_indices = @transform_1, window_bounds = array<i64: 128, 128>}, {pipeline_mode = #tpu.pipeline_mode<synchronous>, transform_indices = @transform_2, window_bounds = array<i64: 8, 128>}, {pipeline_mode = #tpu.pipeline_mode<synchronous>, transform_indices = @transform_3, window_bounds = array<i64: 48, 128>}, {transform_indices = @transform_4, window_bounds = array<i64: 48, 128>}]} {
    %c0_i32 = arith.constant 0 : i32
    %0 = arith.cmpi eq, %arg1, %c0_i32 : i32
    %1 = arith.extui %0 : i1 to i32
    %c0_i32_0 = arith.constant 0 : i32
    %2 = arith.cmpi ne, %1, %c0_i32_0 : i32
    scf.if %2 {
      %cst_10 = arith.constant 0.000000e+00 : f32
      %12 = vector.broadcast %cst_10 : f32 to vector<128x128xf32>
      %c0_11 = arith.constant 0 : index
      %c0_12 = arith.constant 0 : index
      %13 = vector.load %arg7[%c0_11, %c0_12] : memref<128x128xf32, #tpu.memory_space<vmem>>, vector<128x128xf32>
      tpu.vector_store %arg7[%c0_11, %c0_12], %12 {strides = array<i32>} : memref<128x128xf32, #tpu.memory_space<vmem>>, vector<128x128xf32>,
    } else {
    }
    %c0 = arith.constant 0 : index
    %c0_1 = arith.constant 0 : index
    %3 = vector.load %arg7[%c0, %c0_1] : memref<128x128xf32, #tpu.memory_space<vmem>>, vector<128x128xf32>
    %c0_2 = arith.constant 0 : index
    %c0_3 = arith.constant 0 : index
    %4 = vector.load %arg2[%c0_2, %c0_3] : memref<128x128xf32, #tpu.memory_space<vmem>>, vector<128x128xf32>
    %c0_4 = arith.constant 0 : index
    %c0_5 = arith.constant 0 : index
    %5 = vector.load %arg3[%c0_4, %c0_5] : memref<128x128xf32, #tpu.memory_space<vmem>>, vector<128x128xf32>
    %cst = arith.constant dense<0.000000e+00> : vector<128x128xf32>
    %6 = tpu.matmul %4, %5, %cst {dimension_numbers = #tpu.dot_dimension_numbers<[1], [0], [0], [1], [0, 0, 1, 1], [], []>} : vector<128x128xf32>, vector<128x128xf32>, vector<128x128xf32> -> vector<128x128xf32>
    %7 = arith.addf %3, %6 : vector<128x128xf32>
    %c0_6 = arith.constant 0 : index
    %c0_7 = arith.constant 0 : index
    %8 = vector.load %arg7[%c0_6, %c0_7] : memref<128x128xf32, #tpu.memory_space<vmem>>, vector<128x128xf32>
    tpu.vector_store %arg7[%c0_6, %c0_7], %7 {strides = array<i32>} : memref<128x128xf32, #tpu.memory_space<vmem>>, vector<128x128xf32>,
    %c0_i32_8 = arith.constant 0 : i32
    %9 = arith.cmpi eq, %arg1, %c0_i32_8 : i32
    %10 = arith.extui %9 : i1 to i32
    %c0_i32_9 = arith.constant 0 : i32
    %11 = arith.cmpi ne, %10, %c0_i32_9 : i32
    scf.if %11 {
      %c0_10 = arith.constant 0 : index
      %c0_11 = arith.constant 0 : index
      %12 = vector.load %arg4[%c0_10, %c0_11] : memref<8x128xf32, #tpu.memory_space<vmem>>, vector<1x128xf32>
      %c1 = arith.constant 1 : index
      %c0_12 = arith.constant 0 : index
      %13 = vector.load %arg4[%c1, %c0_12] : memref<8x128xf32, #tpu.memory_space<vmem>>, vector<1x128xf32>
      %c2 = arith.constant 2 : index
      %c0_13 = arith.constant 0 : index
      %14 = vector.load %arg4[%c2, %c0_13] : memref<8x128xf32, #tpu.memory_space<vmem>>, vector<1x128xf32>
      %c0_14 = arith.constant 0 : index
      %c0_15 = arith.constant 0 : index
      %15 = vector.load %arg7[%c0_14, %c0_15] : memref<128x128xf32, #tpu.memory_space<vmem>>, vector<128x128xf32>
      %16 = vector.broadcast %12 : vector<1x128xf32> to vector<128x128xf32>
      %17 = arith.addf %15, %16 : vector<128x128xf32>
      %cst_16 = arith.constant 0.000000e+00 : f32
      %18 = vector.broadcast %cst_16 : f32 to vector<128x128xf32>
      %19 = arith.maximumf %17, %18 : vector<128x128xf32>
      %cst_17 = arith.constant dense<0.000000e+00> : vector<128xf32>
      %20 = vector.multi_reduction <add>, %19, %cst_17 [1] : vector<128x128xf32> to vector<128xf32>
      %21 = vector.shape_cast %20 : vector<128xf32> to vector<128x1xf32>
      %cst_18 = arith.constant 1.280000e+02 : f32
      %22 = vector.broadcast %cst_18 : f32 to vector<128x1xf32>
      %23 = arith.divf %21, %22 : vector<128x1xf32>
      %24 = vector.broadcast %23 : vector<128x1xf32> to vector<128x128xf32>
      %25 = arith.subf %19, %24 : vector<128x128xf32>
      %26 = arith.mulf %25, %25 : vector<128x128xf32>
      %cst_19 = arith.constant dense<0.000000e+00> : vector<128xf32>
      %27 = vector.multi_reduction <add>, %26, %cst_19 [1] : vector<128x128xf32> to vector<128xf32>
      %28 = vector.shape_cast %27 : vector<128xf32> to vector<128x1xf32>
      %cst_20 = arith.constant 1.280000e+02 : f32
      %29 = vector.broadcast %cst_20 : f32 to vector<128x1xf32>
      %30 = arith.divf %28, %29 : vector<128x1xf32>
      %31 = vector.broadcast %23 : vector<128x1xf32> to vector<128x128xf32>
      %32 = arith.subf %19, %31 : vector<128x128xf32>
      %cst_21 = arith.constant 9.99999974E-6 : f32
      %33 = vector.broadcast %cst_21 : f32 to vector<128x1xf32>
      %34 = arith.addf %30, %33 : vector<128x1xf32>
      %35 = math.rsqrt %34 : vector<128x1xf32>
      %36 = vector.broadcast %35 : vector<128x1xf32> to vector<128x128xf32>
      %37 = arith.mulf %32, %36 : vector<128x128xf32>
      %38 = vector.broadcast %13 : vector<1x128xf32> to vector<128x128xf32>
      %39 = arith.mulf %37, %38 : vector<128x128xf32>
      %40 = vector.broadcast %14 : vector<1x128xf32> to vector<128x128xf32>
      %41 = arith.addf %39, %40 : vector<128x128xf32>
      %c0_22 = arith.constant 0 : index
      %c0_23 = arith.constant 0 : index
      %42 = vector.load %arg5[%c0_22, %c0_23] : memref<48x128xf32, #tpu.memory_space<vmem>>, vector<48x128xf32>
      %cst_24 = arith.constant dense<0.000000e+00> : vector<48x128xf32>
      %43 = tpu.matmul %42, %41, %cst_24 {dimension_numbers = #tpu.dot_dimension_numbers<[1], [1], [0], [0], [0, 0, 1, 0], [], []>} : vector<48x128xf32>, vector<128x128xf32>, vector<48x128xf32> -> vector<48x128xf32>
      %c0_25 = arith.constant 0 : index
      %c0_26 = arith.constant 0 : index
      %44 = vector.load %arg6[%c0_25, %c0_26] : memref<48x128xf32, #tpu.memory_space<vmem>>, vector<48x128xf32>
      tpu.vector_store %arg6[%c0_25, %c0_26], %43 {strides = array<i32>} : memref<48x128xf32, #tpu.memory_space<vmem>>, vector<48x128xf32>,
    } else {
    }
    return
  }
  func.func @transform_0(%arg0: i32, %arg1: i32) -> (i32, i32) {
    %c0_i32 = arith.constant 0 : i32
    return %arg0, %arg1 : i32, i32
  }
  func.func @transform_1(%arg0: i32, %arg1: i32) -> (i32, i32) {
    %c0_i32 = arith.constant 0 : i32
    %c0_i32_0 = arith.constant 0 : i32
    return %arg1, %c0_i32 : i32, i32
  }
  func.func @transform_2(%arg0: i32, %arg1: i32) -> (i32, i32) {
    %c0_i32 = arith.constant 0 : i32
    %c0_i32_0 = arith.constant 0 : i32
    %c0_i32_1 = arith.constant 0 : i32
    return %c0_i32, %c0_i32_0 : i32, i32
  }
  func.func @transform_3(%arg0: i32, %arg1: i32) -> (i32, i32) {
    %c0_i32 = arith.constant 0 : i32
    %c0_i32_0 = arith.constant 0 : i32
    %c0_i32_1 = arith.constant 0 : i32
    return %c0_i32, %c0_i32_0 : i32, i32
  }
  func.func @transform_4(%arg0: i32, %arg1: i32) -> (i32, i32) {
    %c0_i32 = arith.constant 0 : i32
    %c0_i32_0 = arith.constant 0 : i32
    return %c0_i32, %arg0 : i32, i32
  }
}

</mosaic_0001>

<bundles_post_ra>
// kernel: tpu_custom_call.1
= control target key start
LH: loop header
LB: loop body
LE: loop exit
PB: predicated region body
PF: predicated region fallthrough
CT: control target
= control target key end

     0   :  { %9 = vsyncpa [#allocation4], 0  ;;  %s1254_s0 = inlined_call_operand.hbm [shape: f32[128,128], index: 0, kind: input, shape index: {}]   ;;  %s1255_s1 = inlined_call_operand.hbm [shape: f32[128,128], index: 1, kind: input, shape index: {}]   ;;  %s1256_s2 = inlined_call_operand.hbm [shape: f32[8,128], index: 2, kind: input, shape index: {}]   ;;  %s1257_s3 = inlined_call_operand.hbm [shape: f32[48,128], index: 3, kind: input, shape index: {}]   ;;  %s1258_s4 = inlined_call_operand.hbm [shape: f32[48,128], index: 4, kind: output, shape index: {}]  }
   0x1   :  { %10 = vsyncpa [#allocation7], 0 }
   0x2   :  { %11 = vsyncpa [#allocation10], 0 }
   0x3   :  { %12 = vsyncpa [#allocation5], 0  ;;  %s1018_s15 = smov [#allocation6]   ;;  %s1019_s17 = smov [#allocation3]  }
   0x4   :  { %s30_s16 = sshll.u32 %s1018_s15, 4  ;;  %s18_s18 = sshll.u32 %s1019_s17, 4  ;;  %s31_s16 = int_to_ptr.vmem [resolvable:$true] %s30_s16  ;;  %s19_s18 = int_to_ptr.vmem [resolvable:$true] %s18_s18 }
   0x5   :  { %s918_s19 = scalar_lea.vmem %s31_s16, 2048  ;;  %p923_p1 = scmp.lt.s32.totalorder %s31_s16, %s31_s16 }
   0x6   :  { %p919_p0 = scmp.ne.s32.totalorder %s31_s16, %s918_s19  ;;  %p924_p2 = scmp.lt.s32.totalorder %s918_s19, %s918_s19 }
   0x8   :  { %p925_p3 = por %p924_p2, %p923_p1 }
   0xa   :  { %p926_p4 = pnand %p925_p3, %p919_p0 }
   0xc   :  { %929 = shalt.err (!%p926_p4)
}
   0xd   :  { %s1020_s20 = smov 128   ;;  %s1021_s21 = smov 8  }
   0xe   :  { %36 = dma.hbm_to_vmem [thread:$0]  %s1255_s1, 2048, %s31_s16, [#allocation7], %s1020_s20, %s1020_s20, %s1021_s21  }
   0xf   :  { %s938_s24 = scalar_lea.vmem %s19_s18, 2048  ;;  %p943_p6 = scmp.lt.s32.totalorder %s19_s18, %s19_s18 }
  0x10   :  { %p939_p5 = scmp.ne.s32.totalorder %s19_s18, %s938_s24  ;;  %p944_p7 = scmp.lt.s32.totalorder %s938_s24, %s938_s24 }
  0x12   :  { %p945_p8 = por %p944_p7, %p943_p6 }
  0x14   :  { %p946_p9 = pnand %p945_p8, %p939_p5 }
  0x16   :  { %949 = shalt.err (!%p946_p9)
}
  0x17   :  { %24 = dma.hbm_to_vmem [thread:$0]  %s1254_s0, 2048, %s19_s18, [#allocation4], %s1020_s20, %s1020_s20, %s1021_s21  }
  0x18   :  { %s1022_s27 = smov [#allocation8]   ;;  %s1023_s29 = smov [#allocation9]  }
  0x19   :  { %s43_s28 = sshll.u32 %s1022_s27, 4  ;;  %s52_s30 = sshll.u32 %s1023_s29, 4  ;;  %s44_s28 = int_to_ptr.vmem [resolvable:$true] %s43_s28  ;;  %s53_s30 = int_to_ptr.vmem [resolvable:$true] %s52_s30 }
  0x1a   :  { %s958_s1 = scalar_lea.vmem %s44_s28, 128  ;;  %p963_p11 = scmp.lt.s32.totalorder %s44_s28, %s44_s28 }
  0x1b   :  { %p959_p10 = scmp.ne.s32.totalorder %s44_s28, %s958_s1  ;;  %p964_p12 = scmp.lt.s32.totalorder %s958_s1, %s958_s1 }
  0x1d   :  { %p965_p13 = por %p964_p12, %p963_p11 }
  0x1f   :  { %p966_p0 = pnand %p965_p13, %p959_p10 }
  0x21   :  { %969 = shalt.err (!%p966_p0)
}
  0x22   :  { %46 = dma.hbm_to_vmem [thread:$0]  %s1256_s2, 128, %s44_s28, [#allocation7]  }
  0x23   :  { %s978_s7 = scalar_lea.vmem %s53_s30, 768  ;;  %p983_p2 = scmp.lt.s32.totalorder %s53_s30, %s53_s30 }
  0x24   :  { %p979_p1 = scmp.ne.s32.totalorder %s53_s30, %s978_s7  ;;  %p984_p3 = scmp.lt.s32.totalorder %s978_s7, %s978_s7 }
  0x26   :  { %p985_p4 = por %p984_p3, %p983_p2 }
  0x28   :  { %p986_p5 = pnand %p985_p4, %p979_p1 }
  0x2a   :  { %989 = shalt.err (!%p986_p5)
}
  0x2b   :  { %58 = dma.hbm_to_vmem [thread:$0]  %s1257_s3, 768, %s53_s30, [#allocation10], %s1020_s20, %s1020_s20, %s1021_s21  }
  0x2c   :  { %1010 = dma.done.wait [#allocation4], 2048  }
  0x2d   :  { %1011 = vsyncadd [#allocation4], 4294965248 }
  0x2e   :  { %1012 = dma.done.wait [#allocation7], 2176  }
  0x2f   :  { %1013 = vsyncadd [#allocation7], 4294965120 }
  0x30   :  { %1014 = dma.done.wait [#allocation10], 768  }
  0x31   :  { %1015 = vsyncadd [#allocation10], 4294966528  ;;  %v138_v0 = vld [vmem:[#allocation6 + $0x78] sm:$0xff]  ;;  %v137_v1 = vld [vmem:[#allocation6 + $0x70] sm:$0xff]  ;;  %s1024_s2 = smov [#allocation11]  }
  0x32   :  { %774 = vmatprep.subr.mxu0 %v138_v0  ;;  %v136_v2 = vld [vmem:[#allocation6 + $0x68] sm:$0xff]  ;;  %v135_v3 = vld [vmem:[#allocation6 + $0x60] sm:$0xff]  ;;  %v134_v5 = vld [vmem:[#allocation6 + $0x58] sm:$0xff]  ;;  %s703_s3 = sshll.u32 %s1024_s2, 4  ;;  %s704_s3 = int_to_ptr.vmem [resolvable:$true] %s703_s3 }
  0x33   :  { %775 = vmatpush3.msra.mxu0 %v138_v0  ;;  %v107_v4 = vld [vmem:[#allocation3] sm:$0xff]  ;;  %v133_v6 = vld [vmem:[#allocation6 + $0x50] sm:$0xff]  ;;  %v132_v7 = vld [vmem:[#allocation6 + $0x48] sm:$0xff]  ;;  %s990_s9 = scalar_lea.vmem %s704_s3, 768  ;;  %p995_p7 = scmp.lt.s32.totalorder %s704_s3, %s704_s3 }
  0x34   :  { %776 = vmatprep.subr.mxu0 %v137_v1  ;;  %806 = vmatprep.mubr.f32.mxu0 %v107_v4  ;;  %v131_v8 = vld [vmem:[#allocation6 + $0x40] sm:$0xff]  ;;  %v130_v9 = vld [vmem:[#allocation6 + $0x38] sm:$0xff]  ;;  %v129_v10 = vld [vmem:[#allocation6 + $0x30] sm:$0xff]  ;;  %p991_p6 = scmp.ne.s32.totalorder %s704_s3, %s990_s9  ;;  %p996_p8 = scmp.lt.s32.totalorder %s990_s9, %s990_s9 }
  0x35   :  { %777 = vmatpush3.msra.mxu0 %v137_v1  ;;  %v128_v11 = vld [vmem:[#allocation6 + $0x28] sm:$0xff]  ;;  %v127_v12 = vld [vmem:[#allocation6 + $0x20] sm:$0xff]  ;;  %v126_v13 = vld [vmem:[#allocation6 + $0x18] sm:$0xff] }
  0x36   :  { %778 = vmatprep.subr.mxu0 %v136_v2  ;;  %v125_v14 = vld [vmem:[#allocation6 + $0x10] sm:$0xff]  ;;  %v124_v15 = vld [vmem:[#allocation6 + $0x8] sm:$0xff]  ;;  %v123_v16 = vld [vmem:[#allocation6] sm:$0xff]  ;;  %p997_p9 = por %p996_p8, %p995_p7 }
  0x37   :  { %779 = vmatpush3.msra.mxu0 %v136_v2  ;;  %v108_v17 = vld [vmem:[#allocation3 + $0x8] sm:$0xff]  ;;  %v109_v18 = vld [vmem:[#allocation3 + $0x10] sm:$0xff]  ;;  %v110_v19 = vld [vmem:[#allocation3 + $0x18] sm:$0xff] }
  0x38   :  { %780 = vmatprep.subr.mxu0 %v135_v3  ;;  %v111_v20 = vld [vmem:[#allocation3 + $0x20] sm:$0xff]  ;;  %v112_v21 = vld [vmem:[#allocation3 + $0x28] sm:$0xff]  ;;  %v113_v22 = vld [vmem:[#allocation3 + $0x30] sm:$0xff]  ;;  %p998_p10 = pnand %p997_p9, %p991_p6 }
  0x39   :  { %781 = vmatpush3.msra.mxu0 %v135_v3  ;;  %v114_v23 = vld [vmem:[#allocation3 + $0x38] sm:$0xff]  ;;  %v115_v24 = vld [vmem:[#allocation3 + $0x40] sm:$0xff]  ;;  %v116_v25 = vld [vmem:[#allocation3 + $0x48] sm:$0xff] }
  0x3a   :  { %782 = vmatprep.subr.mxu0 %v134_v5  ;;  %v117_v26 = vld [vmem:[#allocation3 + $0x50] sm:$0xff]  ;;  %v118_v27 = vld [vmem:[#allocation3 + $0x58] sm:$0xff]  ;;  %v119_v28 = vld [vmem:[#allocation3 + $0x60] sm:$0xff] }
  0x3b   :  { %783 = vmatpush3.msra.mxu0 %v134_v5  ;;  %v120_v29 = vld [vmem:[#allocation3 + $0x68] sm:$0xff]  ;;  %v121_v30 = vld [vmem:[#allocation3 + $0x70] sm:$0xff]  ;;  %v122_v31 = vld [vmem:[#allocation3 + $0x78] sm:$0xff] }
  0x3c   :  { %784 = vmatprep.subr.mxu0 %v133_v6  ;;  %v717_v44 = vld [vmem:[#allocation8] ss:$0 sm:$0xff] }
  0x3d   :  { %785 = vmatpush3.msra.mxu0 %v133_v6 }
  0x3e   :  { %786 = vmatprep.subr.mxu0 %v132_v7 }
  0x3f   :  { %787 = vmatpush3.msra.mxu0 %v132_v7 }
  0x40   :  { %788 = vmatprep.subr.mxu0 %v131_v8 }
  0x41   :  { %789 = vmatpush3.msra.mxu0 %v131_v8 }
  0x42   :  { %790 = vmatprep.subr.mxu0 %v130_v9 }
  0x43   :  { %791 = vmatpush3.msra.mxu0 %v130_v9 }
  0x44   :  { %792 = vmatprep.subr.mxu0 %v129_v10 }
  0x45   :  { %793 = vmatpush3.msra.mxu0 %v129_v10 }
  0x46   :  { %794 = vmatprep.subr.mxu0 %v128_v11 }
  0x47   :  { %795 = vmatpush3.msra.mxu0 %v128_v11 }
  0x48   :  { %796 = vmatprep.subr.mxu0 %v127_v12 }
  0x49   :  { %797 = vmatpush3.msra.mxu0 %v127_v12 }
  0x4a   :  { %798 = vmatprep.subr.mxu0 %v126_v13 }
  0x4b   :  { %799 = vmatpush3.msra.mxu0 %v126_v13 }
  0x4c   :  { %800 = vmatprep.subr.mxu0 %v125_v14 }
  0x4d   :  { %801 = vmatpush3.msra.mxu0 %v125_v14 }
  0x4e   :  { %802 = vmatprep.subr.mxu0 %v124_v15 }
  0x4f   :  { %803 = vmatpush3.msra.mxu0 %v124_v15 }
  0x50   :  { %804 = vmatprep.subr.mxu0 %v123_v16 }
  0x51   :  { %805 = vmatpush3.msra.mxu0 %v123_v16 }
  0x52   :  { %807 = vmatmul.mubr.f32.vlgmr.msra.gmra.mxu0 %v108_v17 }
  0x53   :  { %809 = vmatprep.mubr.f32.mxu0 %v109_v18 }
  0x56   :  { %810 = vmatmul.mubr.f32.gmra.mxu0 %v110_v19 }
  0x57   :  { %812 = vmatprep.mubr.f32.mxu0 %v111_v20 }
  0x5a   :  { %813 = vmatmul.mubr.f32.gmra.mxu0 %v112_v21 }
  0x5b   :  { %815 = vmatprep.mubr.f32.mxu0 %v113_v22 }
  0x5e   :  { %816 = vmatmul.mubr.f32.gmra.mxu0 %v114_v23 }
  0x5f   :  { %818 = vmatprep.mubr.f32.mxu0 %v115_v24 }
  0x62   :  { %819 = vmatmul.mubr.f32.gmra.mxu0 %v116_v25 }
  0x63   :  { %821 = vmatprep.mubr.f32.mxu0 %v117_v26 }
  0x66   :  { %822 = vmatmul.mubr.f32.gmra.mxu0 %v118_v27 }
  0x67   :  { %824 = vmatprep.mubr.f32.mxu0 %v119_v28 }
  0x6a   :  { %825 = vmatmul.mubr.f32.gmra.mxu0 %v120_v29 }
  0x6b   :  { %827 = vmatprep.mubr.f32.mxu0 %v121_v30 }
  0x6e   :  { %828 = vmatmul.mubr.f32.gmra.mxu0 %v122_v31 }
 0x112   :  { %v808_v32 = vpop.f32.mrf.mxu0 }
 0x113   :  { %v1107_v13 = vadd.f32 %v808_v32, %v717_v44 }
 0x114   :  { %v205_v33 = vpop.f32.mrf.mxu0 }
 0x115   :  { %v1099_v9 = vadd.f32 %v717_v44, %v205_v33  ;;  %v359_v16 = vmax.f32 %v1107_v13, 0.0  ;;  %v591_v13 = vld [vmem:[#allocation9] sm:$0xff] }
 0x116   :  { %v811_v34 = vpop.f32.mrf.mxu0  ;;  %862 = vmatprep.mubr.f32.mxu1 %v591_v13 }
 0x117   :  { %v1101_v10 = vadd.f32 %v811_v34, %v717_v44  ;;  %v358_v14 = vmax.f32 %v1099_v9, 0.0 }
 0x118   :  { %v215_v35 = vpop.f32.mrf.mxu0 }
 0x119   :  { %v1091_v5 = vadd.f32 %v717_v44, %v215_v35  ;;  %v361_v15 = vmax.f32 %v1101_v10, 0.0 }
 0x11a   :  { %v814_v36 = vpop.f32.mrf.mxu0 }
 0x11b   :  { %v1093_v6 = vadd.f32 %v814_v36, %v717_v44  ;;  %v360_v11 = vmax.f32 %v1091_v5, 0.0 }
 0x11c   :  { %v225_v37 = vpop.f32.mrf.mxu0 }
 0x11d   :  { %v1084_v1 = vadd.f32 %v717_v44, %v225_v37  ;;  %v363_v12 = vmax.f32 %v1093_v6, 0.0 }
 0x11e   :  { %v817_v38 = vpop.f32.mrf.mxu0 }
 0x11f   :  { %v1086_v2 = vadd.f32 %v817_v38, %v717_v44  ;;  %v362_v7 = vmax.f32 %v1084_v1, 0.0 }
 0x120   :  { %v235_v39 = vpop.f32.mrf.mxu0 }
 0x121   :  { %v1079_v61 = vadd.f32 %v717_v44, %v235_v39  ;;  %v365_v8 = vmax.f32 %v1086_v2, 0.0 }
 0x122   :  { %v820_v40 = vpop.f32.mrf.mxu0 }
 0x123   :  { %v351_v62 = vadd.f32 %v820_v40, %v717_v44  ;;  %v364_v3 = vmax.f32 %v1079_v61, 0.0 }
 0x124   :  { %v245_v41 = vpop.f32.mrf.mxu0 }
 0x125   :  { %v1076_v57 = vadd.f32 %v717_v44, %v245_v41  ;;  %v367_v4 = vmax.f32 %v351_v62, 0.0 }
 0x126   :  { %v823_v42 = vpop.f32.mrf.mxu0 }
 0x127   :  { %v353_v58 = vadd.f32 %v823_v42, %v717_v44  ;;  %v366_v63 = vmax.f32 %v1076_v57, 0.0 }
 0x128   :  { %v255_v43 = vpop.f32.mrf.mxu0 }
 0x129   :  { %v1073_v53 = vadd.f32 %v717_v44, %v255_v43  ;;  %v369_v0 = vmax.f32 %v353_v58, 0.0 }
 0x12a   :  { %v826_v45 = vpop.f32.mrf.mxu0 }
 0x12b   :  { %v355_v46 = vadd.f32 %v826_v45, %v717_v44  ;;  %v368_v59 = vmax.f32 %v1073_v53, 0.0 }
 0x12c   :  { %v265_v47 = vpop.f32.mrf.mxu0 }
 0x12d   :  { %v371_v48 = vmax.f32 %v355_v46, 0.0  ;;  %v1071_v49 = vadd.f32 %v717_v44, %v265_v47 }
 0x12e   :  { %v829_v50 = vpop.f32.mrf.mxu0 }
 0x12f   :  { %v357_v51 = vadd.f32 %v829_v50, %v717_v44  ;;  %400 = vadd.xlane.f32.xlu1 %v371_v48  ;;  %v370_v54 = vmax.f32 %v1071_v49, 0.0 }
 0x130   :  { %v275_v52 = vpop.f32.mrf.mxu0 }
 0x131   :  { %v373_v55 = vmax.f32 %v357_v51, 0.0  ;;  %v356_v56 = vadd.f32 %v717_v44, %v275_v52 }
 0x133   :  { %398 = vadd.xlane.f32.xlu1 %v370_v54  ;;  %404 = vadd.xlane.f32.xlu0 %v373_v55  ;;  %v372_v60 = vmax.f32 %v356_v56, 0.0 }
 0x137   :  { %394 = vadd.xlane.f32.xlu1 %v368_v59  ;;  %402 = vadd.xlane.f32.xlu0 %v372_v60 }
 0x13b   :  { %390 = vadd.xlane.f32.xlu1 %v366_v63  ;;  %396 = vadd.xlane.f32.xlu0 %v369_v0 }
 0x13f   :  { %386 = vadd.xlane.f32.xlu1 %v364_v3  ;;  %392 = vadd.xlane.f32.xlu0 %v367_v4 }
 0x143   :  { %382 = vadd.xlane.f32.xlu1 %v362_v7  ;;  %388 = vadd.xlane.f32.xlu0 %v365_v8 }
 0x147   :  { %378 = vadd.xlane.f32.xlu1 %v360_v11  ;;  %384 = vadd.xlane.f32.xlu0 %v363_v12 }
 0x14b   :  { %374 = vadd.xlane.f32.xlu1 %v358_v14  ;;  %380 = vadd.xlane.f32.xlu0 %v361_v15 }
 0x14f   :  { %376 = vadd.xlane.f32.xlu0 %v359_v16 }
 0x1b8   :  { %v401_v17 = vpop.xlane.xlu1 %400 }
 0x1b9   :  { %v420_v20 = vmul.f32 0.0078125, %v401_v17 }
 0x1bb   :  { %v1120_v25 = vsub.f32 %v371_v48, %v420_v20 }
 0x1bc   :  { %v399_v18 = vpop.xlane.xlu1 %398  ;;  %v405_v19 = vpop.xlane.xlu0 %404 }
 0x1bd   :  { %v422_v21 = vmul.f32 0.0078125, %v405_v19  ;;  %v419_v26 = vmul.f32 0.0078125, %v399_v18  ;;  %v452_v35 = vmul.f32 %v1120_v25, %v1120_v25 }
 0x1bf   :  { %v1118_v22 = vsub.f32 %v373_v55, %v422_v21  ;;  %v1126_v33 = vsub.f32 %v370_v54, %v419_v26 }
 0x1c0   :  { %v395_v23 = vpop.xlane.xlu1 %394  ;;  %v403_v24 = vpop.xlane.xlu0 %402 }
 0x1c1   :  { %v421_v27 = vmul.f32 0.0078125, %v403_v24  ;;  %v454_v28 = vmul.f32 %v1118_v22, %v1118_v22  ;;  %v417_v30 = vmul.f32 0.0078125, %v395_v23  ;;  %v451_v43 = vmul.f32 %v1126_v33, %v1126_v33 }
 0x1c3   :  { %v1124_v29 = vsub.f32 %v372_v60, %v421_v27  ;;  %485 = vadd.xlane.f32.xlu0 %v454_v28  ;;  %v1134_v38 = vsub.f32 %v368_v59, %v417_v30 }
 0x1c4   :  { %v391_v31 = vpop.xlane.xlu1 %390  ;;  %v397_v32 = vpop.xlane.xlu0 %396 }
 0x1c5   :  { %v418_v34 = vmul.f32 0.0078125, %v397_v32  ;;  %v453_v36 = vmul.f32 %v1124_v29, %v1124_v29  ;;  %v415_v41 = vmul.f32 0.0078125, %v391_v31  ;;  %v449_v48 = vmul.f32 %v1134_v38, %v1134_v38 }
 0x1c7   :  { %v1132_v37 = vsub.f32 %v369_v0, %v418_v34  ;;  %481 = vadd.xlane.f32.xlu0 %v452_v35  ;;  %483 = vadd.xlane.f32.xlu1 %v453_v36  ;;  %v1146_v49 = vsub.f32 %v366_v63, %v415_v41 }
 0x1c8   :  { %v387_v39 = vpop.xlane.xlu1 %386  ;;  %v393_v40 = vpop.xlane.xlu0 %392 }
 0x1c9   :  { %v416_v42 = vmul.f32 0.0078125, %v393_v40  ;;  %v450_v44 = vmul.f32 %v1132_v37, %v1132_v37  ;;  %v413_v50 = vmul.f32 0.0078125, %v387_v39  ;;  %v447_v57 = vmul.f32 %v1146_v49, %v1146_v49 }
 0x1cb   :  { %v1140_v45 = vsub.f32 %v367_v4, %v416_v42  ;;  %479 = vadd.xlane.f32.xlu1 %v451_v43  ;;  %477 = vadd.xlane.f32.xlu0 %v450_v44  ;;  %v1154_v58 = vsub.f32 %v364_v3, %v413_v50 }
 0x1cc   :  { %v383_v46 = vpop.xlane.xlu1 %382  ;;  %v389_v47 = vpop.xlane.xlu0 %388 }
 0x1cd   :  { %v414_v51 = vmul.f32 0.0078125, %v389_v47  ;;  %v448_v52 = vmul.f32 %v1140_v45, %v1140_v45  ;;  %v411_v54 = vmul.f32 0.0078125, %v383_v46  ;;  %v445_v3 = vmul.f32 %v1154_v58, %v1154_v58 }
 0x1cf   :  { %v1150_v53 = vsub.f32 %v365_v8, %v414_v51  ;;  %475 = vadd.xlane.f32.xlu1 %v449_v48  ;;  %473 = vadd.xlane.f32.xlu0 %v448_v52  ;;  %v1164_v63 = vsub.f32 %v362_v7, %v411_v54  ;;  %v1196_v51 = vld [vmem:[#allocation8 + $0x1] ss:$0 sm:$0xff]  ;;  %v1199_v54 = vld [vmem:[#allocation8 + $0x2] ss:$0 sm:$0xff] }
 0x1d0   :  { %v379_v55 = vpop.xlane.xlu1 %378  ;;  %v385_v56 = vpop.xlane.xlu0 %384 }
 0x1d1   :  { %v412_v59 = vmul.f32 0.0078125, %v385_v56  ;;  %v446_v60 = vmul.f32 %v1150_v53, %v1150_v53  ;;  %v409_v2 = vmul.f32 0.0078125, %v379_v55  ;;  %v443_v1 = vmul.f32 %v1164_v63, %v1164_v63 }
 0x1d3   :  { %v1160_v62 = vsub.f32 %v363_v12, %v412_v59  ;;  %471 = vadd.xlane.f32.xlu1 %v447_v57  ;;  %469 = vadd.xlane.f32.xlu0 %v446_v60  ;;  %v1178_v7 = vsub.f32 %v360_v11, %v409_v2 }
 0x1d4   :  { %v381_v0 = vpop.xlane.xlu0 %380  ;;  %v375_v6 = vpop.xlane.xlu1 %374 }
 0x1d5   :  { %v410_v61 = vmul.f32 0.0078125, %v381_v0  ;;  %v444_v4 = vmul.f32 %v1160_v62, %v1160_v62  ;;  %v407_v17 = vmul.f32 0.0078125, %v375_v6  ;;  %v441_v5 = vmul.f32 %v1178_v7, %v1178_v7 }
 0x1d7   :  { %v1172_v8 = vsub.f32 %v361_v15, %v410_v61  ;;  %467 = vadd.xlane.f32.xlu1 %v445_v3  ;;  %465 = vadd.xlane.f32.xlu0 %v444_v4  ;;  %v1188_v15 = vsub.f32 %v358_v14, %v407_v17 }
 0x1d8   :  { %v377_v12 = vpop.xlane.xlu0 %376 }
 0x1d9   :  { %v408_v18 = vmul.f32 0.0078125, %v377_v12  ;;  %v442_v19 = vmul.f32 %v1172_v8, %v1172_v8  ;;  %v439_v20 = vmul.f32 %v1188_v15, %v1188_v15 }
 0x1db   :  { %v1184_v10 = vsub.f32 %v359_v16, %v408_v18  ;;  %463 = vadd.xlane.f32.xlu1 %v443_v1  ;;  %461 = vadd.xlane.f32.xlu0 %v442_v19 }
 0x1dd   :  { %v440_v11 = vmul.f32 %v1184_v10, %v1184_v10 }
 0x1df   :  { %459 = vadd.xlane.f32.xlu1 %v441_v5  ;;  %457 = vadd.xlane.f32.xlu0 %v440_v11 }
 0x1e3   :  { %455 = vadd.xlane.f32.xlu1 %v439_v20 }
 0x24c   :  { %v486_v16 = vpop.xlane.xlu0 %485 }
 0x24d   :  { %v502_v21 = vmul.f32 0.0078125, %v486_v16 }
 0x24f   :  { %v518_v23 = vadd.f32 1e-05, %v502_v21 }
 0x250   :  { %v484_v9 = vpop.xlane.xlu1 %483  ;;  %v482_v14 = vpop.xlane.xlu0 %481 }
 0x251   :  { %878 = vrsqrt.f32 %v518_v23  ;;  %v501_v24 = vmul.f32 0.0078125, %v484_v9  ;;  %v500_v26 = vmul.f32 0.0078125, %v482_v14 }
 0x253   :  { %v517_v27 = vadd.f32 1e-05, %v501_v24  ;;  %v516_v28 = vadd.f32 1e-05, %v500_v26 }
 0x254   :  { %v480_v30 = vpop.xlane.xlu1 %479  ;;  %v478_v31 = vpop.xlane.xlu0 %477 }
 0x255   :  { %880 = vrsqrt.f32 %v517_v27  ;;  %v499_v32 = vmul.f32 0.0078125, %v480_v30  ;;  %v498_v34 = vmul.f32 0.0078125, %v478_v31 }
 0x256   :  { %882 = vrsqrt.f32 %v516_v28 }
 0x257   :  { %v515_v35 = vadd.f32 1e-05, %v499_v32  ;;  %v514_v36 = vadd.f32 1e-05, %v498_v34 }
 0x258   :  { %v476_v39 = vpop.xlane.xlu1 %475  ;;  %v474_v40 = vpop.xlane.xlu0 %473 }
 0x259   :  { %884 = vrsqrt.f32 %v515_v35  ;;  %v497_v41 = vmul.f32 0.0078125, %v476_v39  ;;  %v496_v42 = vmul.f32 0.0078125, %v474_v40 }
 0x25a   :  { %886 = vrsqrt.f32 %v514_v36 }
 0x25b   :  { %v513_v43 = vadd.f32 1e-05, %v497_v41  ;;  %v512_v46 = vadd.f32 1e-05, %v496_v42 }
 0x25c   :  { %v472_v44 = vpop.xlane.xlu1 %471  ;;  %v470_v50 = vpop.xlane.xlu0 %469 }
 0x25d   :  { %888 = vrsqrt.f32 %v513_v43  ;;  %v495_v47 = vmul.f32 0.0078125, %v472_v44  ;;  %v494_v56 = vmul.f32 0.0078125, %v470_v50 }
 0x25e   :  { %v879_v48 = vpop.eup %878  ;;  %890 = vrsqrt.f32 %v512_v46 }
 0x25f   :  { %v550_v52 = vmul.f32 %v879_v48, %v1118_v22  ;;  %v511_v55 = vadd.f32 1e-05, %v495_v47  ;;  %v510_v6 = vadd.f32 1e-05, %v494_v56 }
 0x260   :  { %v468_v59 = vpop.xlane.xlu1 %467  ;;  %v466_v22 = vpop.xlane.xlu0 %465 }
 0x261   :  { %v570_v57 = vmul.f32 %v1196_v51, %v550_v52  ;;  %v493_v3 = vmul.f32 0.0078125, %v468_v59  ;;  %892 = vrsqrt.f32 %v511_v55 }
 0x262   :  { %v881_v60 = vpop.eup %880  ;;  %894 = vrsqrt.f32 %v510_v6 }
 0x263   :  { %v883_v0 = vpop.eup %882  ;;  %v590_v2 = vadd.f32 %v1199_v54, %v570_v57  ;;  %v549_v61 = vmul.f32 %v881_v60, %v1124_v29  ;;  %v509_v11 = vadd.f32 1e-05, %v493_v3  ;;  %v492_v29 = vmul.f32 0.0078125, %v466_v22 }
 0x264   :  { %v548_v4 = vmul.f32 %v883_v0, %v1120_v25  ;;  %v464_v21 = vpop.xlane.xlu1 %463  ;;  %v462_v14 = vpop.xlane.xlu0 %461 }
 0x265   :  { %830 = vmatprep.subr.mxu1 %v590_v2  ;;  %v569_v12 = vmul.f32 %v1196_v51, %v549_v61  ;;  %896 = vrsqrt.f32 %v509_v11  ;;  %v508_v23 = vadd.f32 1e-05, %v492_v29  ;;  %v491_v9 = vmul.f32 0.0078125, %v464_v21 }
 0x266   :  { %v885_v1 = vpop.eup %884  ;;  %831 = vmatpush3.xpose.msra.mxu1 %v590_v2  ;;  %v568_v17 = vmul.f32 %v1196_v51, %v548_v4  ;;  %v490_v28 = vmul.f32 0.0078125, %v462_v14  ;;  %v594_v14 = vld [vmem:[#allocation9 + $0x18] sm:$0xff] }
 0x267   :  { %v887_v18 = vpop.eup %886  ;;  %v589_v19 = vadd.f32 %v1199_v54, %v569_v12  ;;  %v547_v5 = vmul.f32 %v885_v1, %v1126_v33  ;;  %898 = vrsqrt.f32 %v508_v23 }
 0x268   :  { %v588_v25 = vadd.f32 %v1199_v54, %v568_v17  ;;  %v546_v13 = vmul.f32 %v887_v18, %v1132_v37  ;;  %v507_v37 = vadd.f32 1e-05, %v491_v9  ;;  %v460_v30 = vpop.xlane.xlu1 %459  ;;  %v506_v36 = vadd.f32 1e-05, %v490_v28  ;;  %v593_v9 = vld [vmem:[#allocation9 + $0x10] sm:$0xff] }
 0x269   :  { %832 = vmatprep.subr.mxu1 %v589_v19  ;;  %v567_v20 = vmul.f32 %v1196_v51, %v547_v5  ;;  %v489_v39 = vmul.f32 0.0078125, %v460_v30 }
 0x26a   :  { %v889_v16 = vpop.eup %888  ;;  %833 = vmatpush3.xpose.msra.mxu1 %v589_v19  ;;  %v566_v24 = vmul.f32 %v1196_v51, %v546_v13  ;;  %900 = vrsqrt.f32 %v507_v37 }
 0x26b   :  { %834 = vmatprep.subr.mxu1 %v588_v25  ;;  %v587_v33 = vadd.f32 %v1199_v54, %v567_v20  ;;  %v545_v26 = vmul.f32 %v889_v16, %v1134_v38  ;;  %v891_v27 = vpop.eup %890  ;;  %v458_v38 = vpop.xlane.xlu0 %457  ;;  %v505_v44 = vadd.f32 1e-05, %v489_v39  ;;  %902 = vrsqrt.f32 %v506_v36 }
 0x26c   :  { %v586_v31 = vadd.f32 %v1199_v54, %v566_v24  ;;  %v544_v34 = vmul.f32 %v891_v27, %v1140_v45  ;;  %v488_v46 = vmul.f32 0.0078125, %v458_v38  ;;  %v456_v52 = vpop.xlane.xlu1 %455 }
 0x26d   :  { %v565_v32 = vmul.f32 %v1196_v51, %v545_v26  ;;  %904 = vrsqrt.f32 %v505_v44 }
 0x26e   :  { %835 = vmatpush3.xpose.msra.mxu1 %v588_v25  ;;  %v893_v35 = vpop.eup %892  ;;  %v564_v41 = vmul.f32 %v1196_v51, %v544_v34  ;;  %v504_v55 = vadd.f32 1e-05, %v488_v46 }
 0x26f   :  { %836 = vmatprep.subr.mxu1 %v587_v33  ;;  %v585_v40 = vadd.f32 %v1199_v54, %v565_v32  ;;  %v543_v42 = vmul.f32 %v893_v35, %v1146_v49  ;;  %v895_v43 = vpop.eup %894  ;;  %v487_v49 = vmul.f32 0.0078125, %v456_v52 }
 0x270   :  { %v584_v45 = vadd.f32 %v1199_v54, %v564_v41  ;;  %v542_v50 = vmul.f32 %v895_v43, %v1150_v53  ;;  %906 = vrsqrt.f32 %v504_v55 }
 0x271   :  { %v563_v48 = vmul.f32 %v1196_v51, %v543_v42  ;;  %v503_v0 = vadd.f32 1e-05, %v487_v49 }
 0x272   :  { %837 = vmatpush3.xpose.msra.mxu1 %v587_v33  ;;  %v897_v47 = vpop.eup %896  ;;  %v562_v57 = vmul.f32 %v1196_v51, %v542_v50  ;;  %v595_v33 = vld [vmem:[#allocation9 + $0x20] sm:$0xff] }
 0x273   :  { %838 = vmatprep.subr.mxu1 %v586_v31  ;;  %v583_v59 = vadd.f32 %v1199_v54, %v563_v48  ;;  %v541_v60 = vmul.f32 %v897_v47, %v1154_v58  ;;  %908 = vrsqrt.f32 %v503_v0 }
 0x274   :  { %v899_v56 = vpop.eup %898  ;;  %v582_v2 = vadd.f32 %v1199_v54, %v562_v57 }
 0x275   :  { %v561_v53 = vmul.f32 %v1196_v51, %v541_v60  ;;  %v540_v61 = vmul.f32 %v899_v56, %v1160_v62 }
 0x276   :  { %839 = vmatpush3.xpose.msra.mxu1 %v586_v31 }
 0x277   :  { %840 = vmatprep.subr.mxu1 %v585_v40  ;;  %v901_v3 = vpop.eup %900  ;;  %v581_v4 = vadd.f32 %v1199_v54, %v561_v53  ;;  %v560_v6 = vmul.f32 %v1196_v51, %v540_v61 }
 0x278   :  { %v539_v58 = vmul.f32 %v901_v3, %v1164_v63  ;;  %v903_v22 = vpop.eup %902 }
 0x279   :  { %v580_v1 = vadd.f32 %v1199_v54, %v560_v6  ;;  %v538_v62 = vmul.f32 %v903_v22, %v1172_v8 }
 0x27a   :  { %841 = vmatpush3.xpose.msra.mxu1 %v585_v40  ;;  %v905_v12 = vpop.eup %904  ;;  %v559_v17 = vmul.f32 %v1196_v51, %v539_v58 }
 0x27b   :  { %842 = vmatprep.subr.mxu1 %v584_v45  ;;  %v558_v5 = vmul.f32 %v1196_v51, %v538_v62  ;;  %v537_v11 = vmul.f32 %v905_v12, %v1178_v7 }
 0x27c   :  { %v579_v19 = vadd.f32 %v1199_v54, %v559_v17 }
 0x27d   :  { %v907_v18 = vpop.eup %906  ;;  %v578_v63 = vadd.f32 %v1199_v54, %v558_v5  ;;  %v557_v29 = vmul.f32 %v1196_v51, %v537_v11 }
 0x27e   :  { %843 = vmatpush3.xpose.msra.mxu1 %v584_v45  ;;  %v536_v25 = vmul.f32 %v907_v18, %v1184_v10  ;;  %v592_v10 = vld [vmem:[#allocation9 + $0x8] sm:$0xff] }
 0x27f   :  { %844 = vmatprep.subr.mxu1 %v583_v59  ;;  %v577_v8 = vadd.f32 %v1199_v54, %v557_v29 }
 0x280   :  { %v909_v20 = vpop.eup %908  ;;  %v556_v13 = vmul.f32 %v1196_v51, %v536_v25 }
 0x281   :  { %v535_v16 = vmul.f32 %v909_v20, %v1188_v15  ;;  %v596_v15 = vld [vmem:[#allocation9 + $0x28] sm:$0xff] }
 0x282   :  { %845 = vmatpush3.xpose.msra.mxu1 %v583_v59  ;;  %v576_v7 = vadd.f32 %v1199_v54, %v556_v13 }
 0x283   :  { %846 = vmatprep.subr.mxu1 %v582_v2  ;;  %v555_v21 = vmul.f32 %v1196_v51, %v535_v16 }
 0x285   :  { %v575_v23 = vadd.f32 %v1199_v54, %v555_v21 }
 0x286   :  { %847 = vmatpush3.xpose.msra.mxu1 %v582_v2 }
 0x287   :  { %848 = vmatprep.subr.mxu1 %v581_v4 }
 0x28a   :  { %849 = vmatpush3.xpose.msra.mxu1 %v581_v4 }
 0x28b   :  { %850 = vmatprep.subr.mxu1 %v580_v1 }
 0x28e   :  { %851 = vmatpush3.xpose.msra.mxu1 %v580_v1 }
 0x28f   :  { %852 = vmatprep.subr.mxu1 %v579_v19 }
 0x292   :  { %853 = vmatpush3.xpose.msra.mxu1 %v579_v19 }
 0x293   :  { %854 = vmatprep.subr.mxu1 %v578_v63 }
 0x296   :  { %855 = vmatpush3.xpose.msra.mxu1 %v578_v63 }
 0x297   :  { %856 = vmatprep.subr.mxu1 %v577_v8 }
 0x29a   :  { %857 = vmatpush3.xpose.msra.mxu1 %v577_v8 }
 0x29b   :  { %858 = vmatprep.subr.mxu1 %v576_v7 }
 0x29e   :  { %859 = vmatpush3.xpose.msra.mxu1 %v576_v7 }
 0x29f   :  { %860 = vmatprep.subr.mxu1 %v575_v23 }
 0x2a2   :  { %861 = vmatpush3.xpose.msra.mxu1 %v575_v23 }
 0x2a5   :  { %863 = vmatmul.mubr.f32.vlgmr.msra.gmra.mxu1 %v592_v10 }
 0x2a6   :  { %865 = vmatprep.mubr.f32.mxu1 %v593_v9 }
 0x2a9   :  { %866 = vmatmul.mubr.f32.gmra.mxu1 %v594_v14 }
 0x2aa   :  { %868 = vmatprep.mubr.f32.mxu1 %v595_v33 }
 0x2ad   :  { %869 = vmatmul.mubr.f32.gmra.mxu1 %v596_v15 }
 0x365   :  { %v864_v24 = vpop.f32.mrf.mxu1 }
 0x366   :  { %693 = vst [vmem:[#allocation11 + $0x8] sm:$0xff] %v864_v24 }
 0x367   :  { %v663_v51 = vpop.f32.mrf.mxu1 }
 0x368   :  { %692 = vst [vmem:[#allocation11] sm:$0xff] %v663_v51 }
 0x369   :  { %v867_v26 = vpop.f32.mrf.mxu1 }
 0x36a   :  { %695 = vst [vmem:[#allocation11 + $0x18] sm:$0xff] %v867_v26 }
 0x36b   :  { %v673_v54 = vpop.f32.mrf.mxu1 }
 0x36c   :  { %694 = vst [vmem:[#allocation11 + $0x10] sm:$0xff] %v673_v54 }
 0x36d   :  { %v870_v27 = vpop.f32.mrf.mxu1 }
 0x36e   :  { %697 = vst [vmem:[#allocation11 + $0x28] sm:$0xff] %v870_v27 }
 0x36f   :  { %v683_v28 = vpop.f32.mrf.mxu1 }
 0x370   :  { %696 = vst [vmem:[#allocation11 + $0x20] sm:$0xff] %v683_v28 }
 0x371   :  { %1001 = shalt.err (!%p998_p10)
}
 0x372   :  { %709 = dma.vmem_to_hbm [thread:$0]  %s704_s3, 768, %s1258_s4, [#allocation5], %s1020_s20, %s1020_s20, %s1021_s21  }
 0x373   :  { %1016 = dma.done.wait [#allocation5], 768  }
 0x374   :  { %1017 = vsyncadd [#allocation5], 4294966528 }
 0x375   :  { %713 = vsyncpa [#allocation4], 1 }
 0x376   :  { %714 = vsyncpa [#allocation7], 1 }
 0x377   :  { %715 = vsyncpa [#allocation10], 1 }
 0x378   :  { %716 = vsyncpa [#allocation5], 1 }

</bundles_post_ra>
